<compile_context>
chip_gen: v7x
topology: tpu7x:2x2x1
jax: 0.10.0
libtpu: 0.0.40
codegen_flags: <defaults>
</compile_context>

<pallas_src>
import jax
import jax.numpy as jnp
from jax.experimental import pallas as pl
from jax.experimental.pallas import tpu as pltpu


# ----------------------------- Pallas kernels ------------------------------ #

def _adaln_kernel(c_ref, w_ref, b_ref, shift_ref, scale1_ref):
    # c: (N, H), w: (H, 2H), b: (1, 2H) -> shift, scale1 = 1 + scale : (N, H) f32
    c = c_ref[...].astype(jnp.float32)
    silu = c * (1.0 / (1.0 + jnp.exp(-c)))                      # SiLU (VPU + EUP)
    out = jnp.dot(silu.astype(w_ref.dtype), w_ref[...],
                  preferred_element_type=jnp.float32)
    out = out + b_ref[...].astype(jnp.float32)
    h = shift_ref.shape[-1]
    shift_ref[...] = out[:, :h]
    scale1_ref[...] = out[:, h:] + 1.0


def _final_layer_kernel(x_ref, shift_ref, scale1_ref, w_ref, b_ref, o_ref):
    # x: (tt, H) token tile of one batch; shift/scale1: (1, H) f32 rows selected
    # for this batch by the BlockSpec index_map; w: (H, D_pad) resident weight;
    # b: (1, D_pad); o: (tt, D_pad) lane-dense output tile.
    x = x_ref[...].astype(jnp.float32)

    # LayerNorm (no affine), eps=1e-6, biased variance; one-pass statistics:
    # two independent cross-lane reductions (co-issue on the XLU).
    mu = jnp.mean(x, axis=-1, keepdims=True)
    msq = jnp.mean(x * x, axis=-1, keepdims=True)
    var = jnp.maximum(msq - mu * mu, 0.0)
    xn = (x - mu) * jax.lax.rsqrt(var + 1e-6)

    # modulate: x * (1 + scale) + shift  (scale1 already holds 1 + scale).
    xm = xn * scale1_ref[...] + shift_ref[...]

    # Final projection on the MXU, f32 accumulation, lane-dense store.
    y = jnp.dot(xm.astype(w_ref.dtype), w_ref[...],
                preferred_element_type=jnp.float32)
    o_ref[...] = (y + b_ref[...].astype(jnp.float32)).astype(o_ref.dtype)


# --------------------------- one-time param prep ---------------------------- #

def prepare_final_layer_params(w_ada, b_ada, w_lin, b_lin):
    """One-time conversion from torch layout (call at init, not per forward).

    w_ada: (2H, H), b_ada: (2H,)   -- adaLN_modulation[1] Linear
    w_lin: (D, H),  b_lin: (D,)    -- final Linear, D = patch*patch*out_channels
    Transposes to row-major MXU layout and pads D up to a multiple of 128 so
    the output store is lane-dense.
    """
    H = w_ada.shape[1]
    D = w_lin.shape[0]
    D_pad = -(-D // 128) * 128
    wt_ada = jnp.asarray(w_ada).T                 # (H, 2H)
    b_ada2 = jnp.asarray(b_ada).reshape(1, 2 * H)
    wt_lin = jnp.asarray(w_lin).T                 # (H, D)
    b_pad = jnp.asarray(b_lin)
    if D_pad != D:
        wt_lin = jnp.pad(wt_lin, ((0, 0), (0, D_pad - D)))
        b_pad = jnp.pad(b_pad, (0, D_pad - D))
    return {
        "wt_ada": wt_ada, "b_ada": b_ada2,
        "wt_lin": wt_lin, "b_lin": b_pad.reshape(1, D_pad),
        "H": H, "D": D, "D_pad": D_pad,
    }


# ------------------------- generation-aware tiling --------------------------- #

def _pick_tile_and_vmem(N, T, H, D_pad, x_bytes, w_bytes, block_t):
    try:
        vmem_cap = int(getattr(pltpu.get_tpu_info(), "vmem_capacity_bytes",
                               64 << 20))
    except Exception:                              # no TPU info available
        vmem_cap = 64 << 20                        # conservative: v7x per-TC
    # Explicit scoped-VMEM limit (v5e default is only 16 MiB), with headroom.
    vmem_limit = (min(vmem_cap, 128 << 20) * 3) // 4

    # Resident: (H, D_pad) weight + bias + double-buffered (1, H) shift/scale1.
    resident = (H * D_pad + D_pad) * w_bytes + 4 * H * 4
    # Streamed per token row (double-buffered): x tile in + output tile back.
    per_row = 2 * (H + D_pad) * x_bytes
    tt_cap = max(8, (int(vmem_limit * 0.85) - resident) // per_row)

    if block_t is None:
        block_t = 2048 if x_bytes <= 2 else 1024   # bigger tiles when bf16
    tt = min(T, tt_cap, block_t)
    # Keep >= ~4 grid steps when possible so both v7x TensorCores get work and
    # there is something left to pipeline; never shrink below 256 rows.
    while tt > 256 and N * pl.cdiv(T, tt) < 4:
        tt //= 2
    if tt < T:
        tt = max(8, (tt // 8) * 8)                 # sublane (8) alignment
    return tt, int(vmem_limit)


# ------------------------------ JAX wrapper ---------------------------------- #

def final_layer(x, c, params, *, block_t=None):
    """Forward of DiT FinalLayer.

    x: (N, T, H) tokens, c: (N, H) conditioning, params from
    prepare_final_layer_params.  Returns (N, T, D) in x.dtype.
    Pass bf16 x / weights for the bandwidth-bound fast path; LN/modulate math
    is done in f32 inside the kernel regardless.
    """
    N, T, H = x.shape
    assert c.shape == (N, H)
    assert params["H"] == H
    D, D_pad = params["D"], params["D_pad"]
    wt_lin, b_lin = params["wt_lin"], params["b_lin"]
    wt_ada, b_ada = params["wt_ada"], params["b_ada"]

    tt, vmem_limit = _pick_tile_and_vmem(
        N, T, H, D_pad, jnp.dtype(x.dtype).itemsize,
        jnp.dtype(wt_lin.dtype).itemsize, block_t)

    # ---- adaLN: shift, 1 + scale (kept in f32) ----
    if H % 128 == 0:
        shift, scale1 = pl.pallas_call(
            _adaln_kernel,
            out_shape=(jax.ShapeDtypeStruct((N, H), jnp.float32),
                       jax.ShapeDtypeStruct((N, H), jnp.float32)),
            grid=(1,),
            in_specs=[pl.BlockSpec((N, H), lambda i: (0, 0)),
                      pl.BlockSpec((H, 2 * H), lambda i: (0, 0)),
                      pl.BlockSpec((1, 2 * H), lambda i: (0, 0))],
            out_specs=(pl.BlockSpec((N, H), lambda i: (0, 0)),
                       pl.BlockSpec((N, H), lambda i: (0, 0))),
            compiler_params=pltpu.CompilerParams(
                dimension_semantics=("arbitrary",),
                vmem_limit_bytes=vmem_limit),
        )(c, wt_ada, b_ada)
    else:
        # Non-lane-aligned H: the in-kernel lane split of the (N, 2H) result
        # would force a relayout; this tiny GEMM is cheaper left to XLA.
        mod = (jax.nn.silu(c.astype(jnp.float32))
               @ wt_ada.astype(jnp.float32) + b_ada.astype(jnp.float32))
        shift, scale1 = mod[:, :H], mod[:, H:] + 1.0

    # Per-batch (1, H) rows, selected by the BlockSpec index_map below.
    shift = shift.reshape(N, 1, H)
    scale1 = scale1.reshape(N, 1, H)

    grid = (N, pl.cdiv(T, tt))
    out = pl.pallas_call(
        _final_layer_kernel,
        out_shape=jax.ShapeDtypeStruct((N, T, D_pad), x.dtype),
        grid=grid,
        in_specs=[
            pl.BlockSpec((None, tt, H), lambda b, t: (b, t, 0)),   # x tile
            pl.BlockSpec((None, 1, H), lambda b, t: (b, 0, 0)),    # shift row
            pl.BlockSpec((None, 1, H), lambda b, t: (b, 0, 0)),    # scale1 row
            pl.BlockSpec((H, D_pad), lambda b, t: (0, 0)),         # weight (resident)
            pl.BlockSpec((1, D_pad), lambda b, t: (0, 0)),         # bias (resident)
        ],
        out_specs=pl.BlockSpec((None, tt, D_pad), lambda b, t: (b, t, 0)),
        compiler_params=pltpu.CompilerParams(
            dimension_semantics=("parallel", "parallel"),
            vmem_limit_bytes=vmem_limit),
    )(x, shift, scale1, wt_lin, b_lin)

    return out[..., :D] if D_pad != D else out


# ------------------------------- reference ---------------------------------- #

def _reference(x, c, w_ada, b_ada, w_lin, b_lin):
    H = x.shape[-1]
    mod = jax.nn.silu(c) @ w_ada.T + b_ada
    shift, scale = mod[:, :H], mod[:, H:]
    mu = x.mean(-1, keepdims=True)
    var = ((x - mu) ** 2).mean(-1, keepdims=True)
    xn = (x - mu) / jnp.sqrt(var + 1e-6)
    xm = xn * (1.0 + scale[:, None, :]) + shift[:, None, :]
    return xm @ w_lin.T + b_lin


# --------------------------------- main -------------------------------------- #

def _run_case(key, N, T, hidden, patch, out_ch):
    kx, kc, k1, k2, k3, k4 = jax.random.split(key, 6)
    D = patch * patch * out_ch
    x = jax.random.normal(kx, (N, T, hidden), jnp.float32)
    c = jax.random.normal(kc, (N, hidden), jnp.float32)
    s = 1.0 / (hidden ** 0.5)
    w_ada = jax.random.normal(k1, (2 * hidden, hidden), jnp.float32) * s
    b_ada = jax.random.normal(k2, (2 * hidden,), jnp.float32) * s
    w_lin = jax.random.normal(k3, (D, hidden), jnp.float32) * s
    b_lin = jax.random.normal(k4, (D,), jnp.float32) * s

    params = prepare_final_layer_params(w_ada, b_ada, w_lin, b_lin)
    out = jax.block_until_ready(final_layer(x, c, params))
    ref = _reference(x, c, w_ada, b_ada, w_lin, b_lin)
    assert out.shape == (N, T, D), (out.shape, (N, T, D))
    err = float(jnp.max(jnp.abs(out - ref)))
    assert jnp.allclose(out, ref, atol=5e-3, rtol=5e-3), err


if __name__ == "__main__":
    key = jax.random.PRNGKey(0)
    k1, k2 = jax.random.split(key)
    # Lane-dense D: hidden=128, patch=4, out_channels=8 -> D = 128.
    _run_case(k1, N=2, T=8, hidden=128, patch=4, out_ch=8)
    # Padded-D path: patch=4, out_channels=6 -> D = 96, padded to 128 inside.
    _run_case(k2, N=2, T=8, hidden=128, patch=4, out_ch=6)
    print("KERNEL_OK")
</pallas_src>

<mosaic_0001>
module attributes {stable_mosaic.version = 11 : i64} {
  func.func @_adaln_kernel(%arg0: i32, %arg1: memref<2x128xf32, #tpu.memory_space<vmem>>, %arg2: memref<128x256xf32, #tpu.memory_space<vmem>>, %arg3: memref<1x256xf32, #tpu.memory_space<vmem>>, %arg4: memref<2x128xf32, #tpu.memory_space<vmem>>, %arg5: memref<2x128xf32, #tpu.memory_space<vmem>>) attributes {dimension_semantics = [#tpu.dimension_semantics<arbitrary>], iteration_bounds = array<i64: 1>, scalar_prefetch = 0 : i64, scratch_operands = 0 : i64, tpu.core_type = #tpu.core_type<tc>, window_params = [{pipeline_mode = #tpu.pipeline_mode<synchronous>, transform_indices = @transform_0, window_bounds = array<i64: 2, 128>}, {pipeline_mode = #tpu.pipeline_mode<synchronous>, transform_indices = @transform_1, window_bounds = array<i64: 128, 256>}, {pipeline_mode = #tpu.pipeline_mode<synchronous>, transform_indices = @transform_2, window_bounds = array<i64: 1, 256>}, {pipeline_mode = #tpu.pipeline_mode<synchronous>, transform_indices = @transform_3, window_bounds = array<i64: 2, 128>}, {pipeline_mode = #tpu.pipeline_mode<synchronous>, transform_indices = @transform_4, window_bounds = array<i64: 2, 128>}]} {
    %c0 = arith.constant 0 : index
    %c0_0 = arith.constant 0 : index
    %0 = vector.load %arg1[%c0, %c0_0] : memref<2x128xf32, #tpu.memory_space<vmem>>, vector<2x128xf32>
    %cst = arith.constant 0.000000e+00 : f32
    %1 = vector.broadcast %cst : f32 to vector<2x128xf32>
    %2 = arith.subf %1, %0 : vector<2x128xf32>
    %3 = math.exp %2 : vector<2x128xf32>
    %cst_1 = arith.constant 1.000000e+00 : f32
    %4 = vector.broadcast %cst_1 : f32 to vector<2x128xf32>
    %5 = arith.addf %4, %3 : vector<2x128xf32>
    %cst_2 = arith.constant 1.000000e+00 : f32
    %6 = vector.broadcast %cst_2 : f32 to vector<2x128xf32>
    %7 = arith.divf %6, %5 : vector<2x128xf32>
    %8 = arith.mulf %0, %7 : vector<2x128xf32>
    %c0_3 = arith.constant 0 : index
    %c0_4 = arith.constant 0 : index
    %9 = vector.load %arg2[%c0_3, %c0_4] : memref<128x256xf32, #tpu.memory_space<vmem>>, vector<128x256xf32>
    %cst_5 = arith.constant dense<0.000000e+00> : vector<2x256xf32>
    %10 = tpu.matmul %8, %9, %cst_5 {dimension_numbers = #tpu.dot_dimension_numbers<[1], [0], [0], [1], [0, 0, 1, 1], [], []>} : vector<2x128xf32>, vector<128x256xf32>, vector<2x256xf32> -> vector<2x256xf32>
    %c0_6 = arith.constant 0 : index
    %c0_7 = arith.constant 0 : index
    %11 = vector.load %arg3[%c0_6, %c0_7] : memref<1x256xf32, #tpu.memory_space<vmem>>, vector<1x256xf32>
    %12 = vector.broadcast %11 : vector<1x256xf32> to vector<2x256xf32>
    %13 = arith.addf %10, %12 : vector<2x256xf32>
    %14 = vector.extract_strided_slice %13 {offsets = [0, 0], sizes = [2, 128], strides = [1, 1]} : vector<2x256xf32> to vector<2x128xf32>
    %c0_8 = arith.constant 0 : index
    %c0_9 = arith.constant 0 : index
    %15 = vector.load %arg4[%c0_8, %c0_9] : memref<2x128xf32, #tpu.memory_space<vmem>>, vector<2x128xf32>
    tpu.vector_store %arg4[%c0_8, %c0_9], %14 {strides = array<i32>} : memref<2x128xf32, #tpu.memory_space<vmem>>, vector<2x128xf32>,
    %16 = vector.extract_strided_slice %13 {offsets = [0, 128], sizes = [2, 128], strides = [1, 1]} : vector<2x256xf32> to vector<2x128xf32>
    %cst_10 = arith.constant 1.000000e+00 : f32
    %17 = vector.broadcast %cst_10 : f32 to vector<2x128xf32>
    %18 = arith.addf %16, %17 : vector<2x128xf32>
    %c0_11 = arith.constant 0 : index
    %c0_12 = arith.constant 0 : index
    %19 = vector.load %arg5[%c0_11, %c0_12] : memref<2x128xf32, #tpu.memory_space<vmem>>, vector<2x128xf32>
    tpu.vector_store %arg5[%c0_11, %c0_12], %18 {strides = array<i32>} : memref<2x128xf32, #tpu.memory_space<vmem>>, vector<2x128xf32>,
    return
  }
  func.func @transform_0(%arg0: i32) -> (i32, i32) {
    %c0_i32 = arith.constant 0 : i32
    %c0_i32_0 = arith.constant 0 : i32
    %c0_i32_1 = arith.constant 0 : i32
    return %c0_i32, %c0_i32_0 : i32, i32
  }
  func.func @transform_1(%arg0: i32) -> (i32, i32) {
    %c0_i32 = arith.constant 0 : i32
    %c0_i32_0 = arith.constant 0 : i32
    %c0_i32_1 = arith.constant 0 : i32
    return %c0_i32, %c0_i32_0 : i32, i32
  }
  func.func @transform_2(%arg0: i32) -> (i32, i32) {
    %c0_i32 = arith.constant 0 : i32
    %c0_i32_0 = arith.constant 0 : i32
    %c0_i32_1 = arith.constant 0 : i32
    return %c0_i32, %c0_i32_0 : i32, i32
  }
  func.func @transform_3(%arg0: i32) -> (i32, i32) {
    %c0_i32 = arith.constant 0 : i32
    %c0_i32_0 = arith.constant 0 : i32
    %c0_i32_1 = arith.constant 0 : i32
    return %c0_i32, %c0_i32_0 : i32, i32
  }
  func.func @transform_4(%arg0: i32) -> (i32, i32) {
    %c0_i32 = arith.constant 0 : i32
    %c0_i32_0 = arith.constant 0 : i32
    %c0_i32_1 = arith.constant 0 : i32
    return %c0_i32, %c0_i32_0 : i32, i32
  }
}

</mosaic_0001>

<bundles_post_ra>
// kernel: tpu_custom_call.1
= control target key start
LH: loop header
LB: loop body
LE: loop exit
PB: predicated region body
PF: predicated region fallthrough
CT: control target
= control target key end

     0   :  { %10 = vsyncpa [#allocation3], 0  ;;  %s429_s0 = inlined_call_operand.hbm [shape: f32[2,128], index: 0, kind: input, shape index: {}]   ;;  %s430_s1 = inlined_call_operand.hbm [shape: f32[128,256], index: 1, kind: input, shape index: {}]   ;;  %s431_s2 = inlined_call_operand.vmem [shape: f32[1,256], index: 2, kind: input, shape index: {}]   ;;  %s432_s3 = inlined_call_operand.hbm [shape: f32[2,128], index: 3, kind: output, shape index: {0}]   ;;  %s433_s4 = inlined_call_operand.hbm [shape: f32[2,128], index: 4, kind: output, shape index: {1}]  }
   0x1   :  { %11 = vsyncpa [#allocation6], 0 }
   0x2   :  { %12 = vsyncpa [#allocation4], 0 }
   0x3   :  { %13 = vsyncpa [#allocation9], 0  ;;  %s339_s15 = smov [#allocation2]   ;;  %s340_s17 = smov [#allocation5]  }
   0x4   :  { %s20_s16 = sshll.u32 %s339_s15, 4  ;;  %s29_s18 = sshll.u32 %s340_s17, 4  ;;  %s21_s16 = int_to_ptr.vmem [resolvable:$true] %s20_s16  ;;  %s371_s18 = int_to_ptr.vmem [resolvable:$true] %s29_s18 }
   0x5   :  { %s243_s21 = scalar_lea.hbm %s429_s0, 32 }
   0x6   :  { %p244_p0 = scmp.ne.s32.totalorder %s429_s0, %s243_s21  ;;  %p247_p1 = scmp.lt.u32.totalorder %s243_s21, %s429_s0 }
   0x8   :  { %p249_p2 = pnand %p247_p1, %p244_p0 }
   0xa   :  { %252 = shalt.err (!%p249_p2)
}
   0xb   :  { %s253_s26 = scalar_lea.vmem %s21_s16, 32  ;;  %p258_p4 = scmp.lt.s32.totalorder %s21_s16, %s21_s16 }
   0xc   :  { %p254_p3 = scmp.ne.s32.totalorder %s21_s16, %s253_s26  ;;  %p259_p5 = scmp.lt.s32.totalorder %s253_s26, %s253_s26 }
   0xe   :  { %p260_p6 = por %p259_p5, %p258_p4 }
  0x10   :  { %p261_p7 = pnand %p260_p6, %p254_p3 }
  0x12   :  { %264 = shalt.err (!%p261_p7)
}
  0x13   :  { %23 = dma.hbm_to_vmem [thread:$0]  %s429_s0, 32, %s21_s16, [#allocation3]  }
  0x14   :  { %s265_s5 = scalar_lea.hbm %s430_s1, 4096 }
  0x15   :  { %p266_p8 = scmp.ne.s32.totalorder %s430_s1, %s265_s5  ;;  %p269_p9 = scmp.lt.u32.totalorder %s265_s5, %s430_s1 }
  0x17   :  { %p271_p10 = pnand %p269_p9, %p266_p8 }
  0x19   :  { %274 = shalt.err (!%p271_p10)
}
  0x1a   :  { %s275_s10 = scalar_lea.vmem %s371_s18, 4096  ;;  %p280_p12 = scmp.lt.s32.totalorder %s371_s18, %s371_s18 }
  0x1b   :  { %p276_p11 = scmp.ne.s32.totalorder %s371_s18, %s275_s10  ;;  %p281_p13 = scmp.lt.s32.totalorder %s275_s10, %s275_s10 }
  0x1d   :  { %p282_p0 = por %p281_p13, %p280_p12 }
  0x1f   :  { %p283_p1 = pnand %p282_p0, %p276_p11 }
  0x21   :  { %286 = shalt.err (!%p283_p1)
}
  0x22   :  { %s341_s0 = smov 256   ;;  %s342_s11 = smov 16  }
  0x23   :  { %35 = dma.hbm_to_vmem [thread:$0]  %s430_s1, 4096, %s371_s18, [#allocation6], %s341_s0, %s341_s0, %s342_s11  }
  0x24   :  { %331 = dma.done.wait [#allocation3], 32  }
  0x25   :  { %332 = vsyncadd [#allocation3], 4294967264 }
  0x26   :  { %333 = dma.done.wait [#allocation6], 4096  }
  0x27   :  { %334 = vsyncadd [#allocation6], 4294963200  ;;  %v343_v0 = vmov 0.0   ;;  %v53_v1 = vld [vmem:[#allocation5 + $0x8] sm:$0xff]  ;;  %v55_v2 = vld [vmem:[#allocation5 + $0x18] sm:$0xff]  ;;  %v86_v56 = vlaneseq  ;;  %s344_s15 = smov [#allocation7]  }
  0x28   :  { %160 = vmatprep.mubr.f32.mxu0 %v343_v0  ;;  %v52_v3 = vld [vmem:[#allocation5] sm:$0xff]  ;;  %v200_v4 = vpack.c.bf16 %v55_v2, %v53_v1  ;;  %v54_v5 = vld [vmem:[#allocation5 + $0x10] sm:$0xff]  ;;  %v57_v6 = vld [vmem:[#allocation5 + $0x28] sm:$0xff]  ;;  %s176_s16 = sshll.u32 %s344_s15, 4  ;;  %s345_s17 = smov [#allocation8]   ;;  %s177_s16 = int_to_ptr.vmem [resolvable:$true] %s176_s16 }
  0x29   :  { %v59_v7 = vld [vmem:[#allocation5 + $0x38] sm:$0xff]  ;;  %v202_v8 = vpack.c.bf16 %v54_v5, %v52_v3  ;;  %v56_v10 = vld [vmem:[#allocation5 + $0x20] sm:$0xff]  ;;  %v58_v11 = vld [vmem:[#allocation5 + $0x30] sm:$0xff]  ;;  %v87_v57 = vshrl.u32 %v86_v56, 7  ;;  %s186_s18 = sshll.u32 %s345_s17, 4  ;;  %s287_s19 = scalar_lea.vmem %s177_s16, 32  ;;  %s187_s18 = int_to_ptr.vmem [resolvable:$true] %s186_s18 }
  0x2a   :  { %v204_v9 = vpack.c.bf16 %v59_v7, %v57_v6  ;;  %v61_v12 = vld [vmem:[#allocation5 + $0x48] sm:$0xff]  ;;  %201 = vmatprep.subr.bf16.mxu0 %v200_v4  ;;  %v63_v13 = vld [vmem:[#allocation5 + $0x58] sm:$0xff]  ;;  %v206_v14 = vpack.c.bf16 %v58_v11, %v56_v10  ;;  %v60_v16 = vld [vmem:[#allocation5 + $0x40] sm:$0xff]  ;;  %p288_p2 = scmp.ne.s32.totalorder %s177_s16, %s287_s19  ;;  %p292_p3 = scmp.lt.s32.totalorder %s177_s16, %s177_s16 }
  0x2b   :  { %203 = vmatpush1.bf16.msra.mxu0 %v202_v8  ;;  %v208_v15 = vpack.c.bf16 %v63_v13, %v61_v12  ;;  %v62_v17 = vld [vmem:[#allocation5 + $0x50] sm:$0xff]  ;;  %v65_v18 = vld [vmem:[#allocation5 + $0x68] sm:$0xff]  ;;  %v67_v19 = vld [vmem:[#allocation5 + $0x78] sm:$0xff]  ;;  %v88_v58 = vsub.s32 0, %v87_v57  ;;  %v92_v60 = vsub.s32 1, %v87_v57  ;;  %p293_p4 = scmp.lt.s32.totalorder %s287_s19, %s287_s19 }
  0x2c   :  { %205 = vmatprep.subr.bf16.mxu0 %v204_v9  ;;  %v210_v20 = vpack.c.bf16 %v62_v17, %v60_v16  ;;  %v212_v21 = vpack.c.bf16 %v67_v19, %v65_v18  ;;  %v64_v22 = vld [vmem:[#allocation5 + $0x60] sm:$0xff]  ;;  %v66_v23 = vld [vmem:[#allocation5 + $0x70] sm:$0xff]  ;;  %v69_v24 = vld [vmem:[#allocation5 + $0x88] sm:$0xff] }
  0x2d   :  { %v71_v25 = vld [vmem:[#allocation5 + $0x98] sm:$0xff]  ;;  %v214_v28 = vpack.c.bf16 %v66_v23, %v64_v22  ;;  %v68_v30 = vld [vmem:[#allocation5 + $0x80] sm:$0xff]  ;;  %v70_v31 = vld [vmem:[#allocation5 + $0x90] sm:$0xff]  ;;  %p294_p5 = por %p293_p4, %p292_p3 }
  0x2e   :  { %v44_v26 = vld [vmem:[#allocation2] sm:$0x3]  ;;  %v216_v29 = vpack.c.bf16 %v71_v25, %v69_v24  ;;  %v73_v33 = vld [vmem:[#allocation5 + $0xa8] sm:$0xff]  ;;  %v218_v35 = vpack.c.bf16 %v70_v31, %v68_v30  ;;  %v72_v37 = vld [vmem:[#allocation5 + $0xa0] sm:$0xff] }
  0x2f   :  { %207 = vmatpush1.bf16.msra.mxu0 %v206_v14  ;;  %v45_v27 = vsub.f32 0.0, %v44_v26  ;;  %v75_v34 = vld [vmem:[#allocation5 + $0xb8] sm:$0xff]  ;;  %v74_v38 = vld [vmem:[#allocation5 + $0xb0] sm:$0xff]  ;;  %v77_v39 = vld [vmem:[#allocation5 + $0xc8] sm:$0xff]  ;;  %p295_p6 = pnand %p294_p5, %p288_p2 }
  0x30   :  { %209 = vmatprep.subr.bf16.mxu0 %v208_v15  ;;  %v220_v36 = vpack.c.bf16 %v75_v34, %v73_v33  ;;  %v79_v40 = vld [vmem:[#allocation5 + $0xd8] sm:$0xff]  ;;  %v222_v41 = vpack.c.bf16 %v74_v38, %v72_v37  ;;  %v76_v43 = vld [vmem:[#allocation5 + $0xc0] sm:$0xff]  ;;  %v78_v44 = vld [vmem:[#allocation5 + $0xd0] sm:$0xff] }
  0x31   :  { %v46_v32 = vmul.f32 1.442695, %v45_v27  ;;  %v224_v42 = vpack.c.bf16 %v79_v40, %v77_v39  ;;  %v81_v45 = vld [vmem:[#allocation5 + $0xe8] sm:$0xff]  ;;  %v83_v46 = vld [vmem:[#allocation5 + $0xf8] sm:$0xff]  ;;  %v226_v47 = vpack.c.bf16 %v78_v44, %v76_v43  ;;  %v80_v50 = vld [vmem:[#allocation5 + $0xe0] sm:$0xff] }
  0x32   :  { %v228_v49 = vpack.c.bf16 %v83_v46, %v81_v45  ;;  %v82_v51 = vld [vmem:[#allocation5 + $0xf0] sm:$0xff]  ;;  %v84_v59 = vld [vmem:[%s431_s2] sm:$0x3] }
  0x33   :  { %211 = vmatpush1.bf16.msra.mxu0 %v210_v20  ;;  %239 = vpow2.f32 %v46_v32  ;;  %v230_v53 = vpack.c.bf16 %v82_v51, %v80_v50  ;;  %v89_v61 = vrot.slane %v84_v59, %v88_v58  ;;  %v93_v62 = vrot.slane %v84_v59, %v92_v60 }
  0x34   :  { %213 = vmatprep.subr.bf16.mxu0 %v212_v21 }
  0x37   :  { %215 = vmatpush1.bf16.msra.mxu0 %v214_v28 }
  0x38   :  { %217 = vmatprep.subr.bf16.mxu0 %v216_v29 }
  0x3b   :  { %219 = vmatpush1.bf16.msra.mxu0 %v218_v35 }
  0x3c   :  { %221 = vmatprep.subr.bf16.mxu0 %v220_v36 }
  0x3d   :  { %v240_v48 = vpop.eup %239 }
  0x3e   :  { %v48_v52 = vadd.f32 1.0, %v240_v48 }
  0x3f   :  { %223 = vmatpush1.bf16.msra.mxu0 %v222_v41 }
  0x40   :  { %225 = vmatprep.subr.bf16.mxu0 %v224_v42  ;;  %241 = vrcp.f32 %v48_v52 }
  0x43   :  { %227 = vmatpush1.bf16.msra.mxu0 %v226_v47 }
  0x44   :  { %229 = vmatprep.subr.bf16.mxu0 %v228_v49 }
  0x47   :  { %231 = vmatpush1.bf16.msra.mxu0 %v230_v53 }
  0x4a   :  { %v242_v54 = vpop.eup %241 }
  0x4b   :  { %v51_v55 = vmul.f32 %v242_v54, %v44_v26 }
  0x4d   :  { %161 = vmatmul.mubr.f32.vlgmr.msra.gmra.mrb[0].mxu0 %v51_v55 }
 0x120   :  { %v162_v63 = vpop.f32.mrb[0].mxu0 }
 0x121   :  { %v163_v0 = vadd.f32 %v162_v63, %v89_v61  ;;  %v164_v1 = vpop.f32.mrb[1].mxu0 }
 0x122   :  { %v165_v2 = vadd.f32 %v164_v1, %v93_v62 }
 0x123   :  { %167 = vst [vmem:[#allocation7] sm:$0x3] %v163_v0 }
 0x124   :  { %v168_v3 = vadd.f32 1.0, %v165_v2 }
 0x125   :  { %298 = shalt.err (!%p295_p6)
}
 0x126   :  { %s299_s21 = scalar_lea.hbm %s432_s3, 32 }
 0x127   :  { %p300_p7 = scmp.ne.s32.totalorder %s432_s3, %s299_s21  ;;  %p303_p8 = scmp.lt.u32.totalorder %s299_s21, %s432_s3 }
 0x129   :  { %p305_p9 = pnand %p303_p8, %p300_p7 }
 0x12b   :  { %308 = shalt.err (!%p305_p9)
}
 0x12c   :  { %179 = dma.vmem_to_hbm [thread:$0]  %s177_s16, 32, %s432_s3, [#allocation4]   ;;  %169 = vst [vmem:[#allocation8] sm:$0x3] %v168_v3 }
 0x12d   :  { %s309_s28 = scalar_lea.vmem %s187_s18, 32  ;;  %p314_p11 = scmp.lt.s32.totalorder %s187_s18, %s187_s18 }
 0x12e   :  { %p310_p10 = scmp.ne.s32.totalorder %s187_s18, %s309_s28  ;;  %p315_p12 = scmp.lt.s32.totalorder %s309_s28, %s309_s28 }
 0x130   :  { %p316_p13 = por %p315_p12, %p314_p11 }
 0x132   :  { %p317_p0 = pnand %p316_p13, %p310_p10 }
 0x134   :  { %320 = shalt.err (!%p317_p0)
}
 0x135   :  { %s321_s5 = scalar_lea.hbm %s433_s4, 32 }
 0x136   :  { %p322_p1 = scmp.ne.s32.totalorder %s433_s4, %s321_s5  ;;  %p325_p2 = scmp.lt.u32.totalorder %s321_s5, %s433_s4 }
 0x138   :  { %p327_p3 = pnand %p325_p2, %p322_p1 }
 0x13a   :  { %330 = shalt.err (!%p327_p3)
}
 0x13b   :  { %189 = dma.vmem_to_hbm [thread:$0]  %s187_s18, 32, %s433_s4, [#allocation9]  }
 0x13c   :  { %335 = dma.done.wait [#allocation4], 32  }
 0x13d   :  { %336 = vsyncadd [#allocation4], 4294967264 }
 0x13e   :  { %337 = dma.done.wait [#allocation9], 32  }
 0x13f   :  { %338 = vsyncadd [#allocation9], 4294967264 }
 0x140   :  { %196 = vsyncpa [#allocation3], 1 }
 0x141   :  { %197 = vsyncpa [#allocation6], 1 }
 0x142   :  { %198 = vsyncpa [#allocation4], 1 }
 0x143   :  { %199 = vsyncpa [#allocation9], 1 }

</bundles_post_ra>
